<compile_context>
chip_gen: v6e
topology: v6e:2x2x1
jax: 0.10.0
libtpu: 0.0.40
codegen_flags: <defaults>
</compile_context>

<pallas_src>
import functools
import math

import jax
import jax.numpy as jnp
from jax import lax
from jax.experimental import pallas as pl
from jax.experimental.pallas import tpu as pltpu

# ----------------------------- model config (small) -----------------------------
D_MODEL = 128
D_FF = 256
N_HEADS = 4
D_HEAD = D_MODEL // N_HEADS
N_LAYERS = 2
VOCAB_SRC = 16
VOCAB_TGT = 16
MAX_LEN = 5000          # same default as the reference PositionalEncoding
EPS = 1e-6              # LayerNorm eps in the annotated transformer
NEG_INF = -1e9
EMB_SCALE = math.sqrt(D_MODEL)


# ----------------------------- shared in-kernel math -----------------------------
def _layernorm_math(x, g, b):
    # Annotated-transformer LayerNorm: a2 * (x - mean) / (std + eps) + b2
    # torch .std() is unbiased (ddof=1).  f32 VPU math, EUP reciprocal.
    d = x.shape[-1]
    mean = jnp.mean(x, axis=-1, keepdims=True)
    c = x - mean
    var = jnp.sum(c * c, axis=-1, keepdims=True) * (1.0 / (d - 1))
    inv = pl.reciprocal(jnp.sqrt(var) + EPS, approx=True)
    return g * c * inv + b


def _mha_proj_math(q, k, v, bias, wo):
    """Per-head attention, accumulated straight through Wo head-slices.

    q: (Sq, D) f32, k/v: (Sk, D) f32, bias: additive (Sq|1, Sk) f32,
    wo: (D, D) bf16.  The 1/sqrt(D_HEAD) scale is folded into the Q projection.
    Returns the already-output-projected context, (Sq, D) f32 (no concat).
    """
    out = None
    for h in range(N_HEADS):
        sl = slice(h * D_HEAD, (h + 1) * D_HEAD)
        # q @ k^T without materializing a transpose: contract D_head of both.
        s = lax.dot_general(q[:, sl].astype(jnp.bfloat16),
                            k[:, sl].astype(jnp.bfloat16),
                            (((1,), (1,)), ((), ())),
                            preferred_element_type=jnp.float32) + bias
        s = s - jnp.max(s, axis=-1, keepdims=True)
        p = jnp.exp(s)
        p = p * pl.reciprocal(jnp.sum(p, axis=-1, keepdims=True), approx=True)
        ctx = jnp.dot(p.astype(jnp.bfloat16), v[:, sl].astype(jnp.bfloat16),
                      preferred_element_type=jnp.float32)           # (Sq, D_HEAD)
        part = jnp.dot(ctx.astype(jnp.bfloat16), wo[sl, :],
                       preferred_element_type=jnp.float32)           # (Sq, D)
        out = part if out is None else out + part
    return out


def _causal_bias(s):
    # Additive causal mask generated in-kernel (no O(S^2) f32 bias DMA).
    r = lax.broadcasted_iota(jnp.int32, (s, s), 0)
    c = lax.broadcasted_iota(jnp.int32, (s, s), 1)
    return jnp.where(c <= r, jnp.float32(0.0), jnp.float32(NEG_INF))


# ----------------------------- Pallas kernels -----------------------------------
def _pe_add_kernel(x_ref, pe_ref, o_ref):
    # PositionalEncoding.forward: x + pe[:, :S]   (dropout = identity, inference)
    o_ref[...] = x_ref[...] + pe_ref[...]          # (B,S,D) + (S,D) broadcast


def _enc_layer_kernel(x_ref, pe_ref, kmask_ref,
                      g1_ref, b1_ref, wqkv_ref, bqkv_ref, wo_ref, bo_ref,
                      g2_ref, b2_ref, w1_ref, f1_ref, w2_ref, f2_ref,
                      gf_ref, bf_ref, o_ref, *, bpb, add_pe, final_ln):
    # One whole encoder layer (both sublayers); optional fused PE/embed-scale on
    # the first layer and final encoder LayerNorm on the last layer.
    for b in range(bpb):                                   # static unroll
        x = x_ref[b]                                       # (S, D) f32
        if add_pe:
            x = x * EMB_SCALE + pe_ref[...]                # fused PositionalEncoding
        bias = (kmask_ref[b] - 1.0) * (-NEG_INF)           # (1, Sk) additive key mask
        # ---- self-attention sublayer ----
        y = _layernorm_math(x, g1_ref[...], b1_ref[...])
        qkv = jnp.dot(y.astype(jnp.bfloat16), wqkv_ref[...],
                      preferred_element_type=jnp.float32) + bqkv_ref[...]
        q = qkv[:, :D_MODEL]
        k = qkv[:, D_MODEL:2 * D_MODEL]
        v = qkv[:, 2 * D_MODEL:]
        x = x + _mha_proj_math(q, k, v, bias, wo_ref[...]) + bo_ref[...]
        # ---- feed-forward sublayer ----
        y = _layernorm_math(x, g2_ref[...], b2_ref[...])
        h = jnp.dot(y.astype(jnp.bfloat16), w1_ref[...],
                    preferred_element_type=jnp.float32) + f1_ref[...]
        h = jnp.maximum(h, 0.0)
        x = x + jnp.dot(h.astype(jnp.bfloat16), w2_ref[...],
                        preferred_element_type=jnp.float32) + f2_ref[...]
        if final_ln:
            x = _layernorm_math(x, gf_ref[...], bf_ref[...])
        o_ref[b] = x


def _dec_layer_kernel(x_ref, mem_ref, pe_ref, smask_ref,
                      g1_ref, b1_ref, wqkv_ref, bqkv_ref, wo1_ref, bo1_ref,
                      g2_ref, b2_ref, wq_ref, bq_ref, wkv_ref, bkv_ref,
                      wo2_ref, bo2_ref,
                      g3_ref, b3_ref, w1_ref, f1_ref, w2_ref, f2_ref,
                      gf_ref, bf_ref, o_ref, *, bpb, add_pe, final_ln):
    # One whole decoder layer: causal self-attn + cross-attn + FFN; optional
    # fused PE/embed-scale (first layer) and final decoder LN (last layer).
    st = x_ref.shape[1]
    causal = _causal_bias(st)                              # (St, St), in-kernel
    for b in range(bpb):
        x = x_ref[b]                                       # (St, D)
        mem = mem_ref[b]                                   # (Ss, D)
        if add_pe:
            x = x * EMB_SCALE + pe_ref[...]
        # ---- masked self-attention ----
        y = _layernorm_math(x, g1_ref[...], b1_ref[...])
        qkv = jnp.dot(y.astype(jnp.bfloat16), wqkv_ref[...],
                      preferred_element_type=jnp.float32) + bqkv_ref[...]
        q = qkv[:, :D_MODEL]
        k = qkv[:, D_MODEL:2 * D_MODEL]
        v = qkv[:, 2 * D_MODEL:]
        x = x + _mha_proj_math(q, k, v, causal, wo1_ref[...]) + bo1_ref[...]
        # ---- cross-attention over encoder memory ----
        cbias = (smask_ref[b] - 1.0) * (-NEG_INF)          # (1, Ss)
        y = _layernorm_math(x, g2_ref[...], b2_ref[...])
        q = jnp.dot(y.astype(jnp.bfloat16), wq_ref[...],
                    preferred_element_type=jnp.float32) + bq_ref[...]
        kv = jnp.dot(mem.astype(jnp.bfloat16), wkv_ref[...],
                     preferred_element_type=jnp.float32) + bkv_ref[...]
        k = kv[:, :D_MODEL]
        v = kv[:, D_MODEL:]
        x = x + _mha_proj_math(q, k, v, cbias, wo2_ref[...]) + bo2_ref[...]
        # ---- feed-forward ----
        y = _layernorm_math(x, g3_ref[...], b3_ref[...])
        h = jnp.dot(y.astype(jnp.bfloat16), w1_ref[...],
                    preferred_element_type=jnp.float32) + f1_ref[...]
        h = jnp.maximum(h, 0.0)
        x = x + jnp.dot(h.astype(jnp.bfloat16), w2_ref[...],
                        preferred_element_type=jnp.float32) + f2_ref[...]
        if final_ln:
            x = _layernorm_math(x, gf_ref[...], bf_ref[...])
        o_ref[b] = x


# ----------------------------- kernel wrappers -----------------------------------
def positional_encoding_forward(x, pe_table):
    """The spec module's forward: x + pe[:, :x.shape[1]] (dropout = identity)."""
    b, s, d = x.shape
    return pl.pallas_call(
        _pe_add_kernel,
        out_shape=jax.ShapeDtypeStruct((b, s, d), jnp.float32),
        grid=(1,),
        in_specs=[
            pl.BlockSpec((b, s, d), lambda i: (0, 0, 0)),
            pl.BlockSpec((s, d), lambda i: (0, 0)),   # only first S rows DMA'd
        ],
        out_specs=pl.BlockSpec((b, s, d), lambda i: (0, 0, 0)),
    )(x, pe_table)


def _param_spec(arr):
    # All params are 2D (weights / (1,D) rows); replicated across grid steps.
    return pl.BlockSpec(arr.shape, lambda i: (0, 0))


def encoder_layer_call(x, pe, src_mask, lp, lnf_g, lnf_b, *, add_pe, final_ln, nb):
    B, S, D = x.shape
    bpb = B // nb                                # batches per grid step
    sa, ff = lp["self_attn"], lp["ff"]
    args = (x, pe, src_mask,
            lp["ln1_g"], lp["ln1_b"], sa["w_qkv"], sa["b_qkv"], sa["wo"], sa["bo"],
            lp["ln2_g"], lp["ln2_b"], ff["w1"], ff["b1"], ff["w2"], ff["b2"],
            lnf_g, lnf_b)
    in_specs = [pl.BlockSpec((bpb, S, D), lambda i: (i, 0, 0)),
                pl.BlockSpec((S, D), lambda i: (0, 0)),
                pl.BlockSpec((bpb, 1, S), lambda i: (i, 0, 0))]
    in_specs += [_param_spec(a) for a in args[3:]]
    return pl.pallas_call(
        functools.partial(_enc_layer_kernel, bpb=bpb, add_pe=add_pe, final_ln=final_ln),
        out_shape=jax.ShapeDtypeStruct((B, S, D), jnp.float32),
        grid=(nb,),
        in_specs=in_specs,
        out_specs=pl.BlockSpec((bpb, S, D), lambda i: (i, 0, 0)),
        compiler_params=pltpu.CompilerParams(dimension_semantics=("parallel",)),
    )(*args)


def decoder_layer_call(x, memory, pe, src_mask, lp, lnf_g, lnf_b,
                       *, add_pe, final_ln, nb):
    B, St, D = x.shape
    Ss = memory.shape[1]
    bpb = B // nb
    sa, ca, ff = lp["self_attn"], lp["src_attn"], lp["ff"]
    args = (x, memory, pe, src_mask,
            lp["ln1_g"], lp["ln1_b"], sa["w_qkv"], sa["b_qkv"], sa["wo"], sa["bo"],
            lp["ln2_g"], lp["ln2_b"], ca["wq"], ca["bq"], ca["w_kv"], ca["b_kv"],
            ca["wo"], ca["bo"],
            lp["ln3_g"], lp["ln3_b"], ff["w1"], ff["b1"], ff["w2"], ff["b2"],
            lnf_g, lnf_b)
    in_specs = [pl.BlockSpec((bpb, St, D), lambda i: (i, 0, 0)),
                pl.BlockSpec((bpb, Ss, D), lambda i: (i, 0, 0)),
                pl.BlockSpec((St, D), lambda i: (0, 0)),
                pl.BlockSpec((bpb, 1, Ss), lambda i: (i, 0, 0))]
    in_specs += [_param_spec(a) for a in args[4:]]
    return pl.pallas_call(
        functools.partial(_dec_layer_kernel, bpb=bpb, add_pe=add_pe, final_ln=final_ln),
        out_shape=jax.ShapeDtypeStruct((B, St, D), jnp.float32),
        grid=(nb,),
        in_specs=in_specs,
        out_specs=pl.BlockSpec((bpb, St, D), lambda i: (i, 0, 0)),
        compiler_params=pltpu.CompilerParams(dimension_semantics=("parallel",)),
    )(*args)


# ----------------------------- transformer forward --------------------------------
def encode(params, src, src_mask, nb):
    # TODO(synk): token-embedding gather has no clean tiny-Pallas equivalent;
    # the gather is left to XLA.  The sqrt(d_model) scale + PE add are fused
    # into the first encoder-layer kernel.
    x = jnp.take(params["src_emb"], src, axis=0)
    n = len(params["enc_layers"])
    for li, lp in enumerate(params["enc_layers"]):
        x = encoder_layer_call(x, params["pe"], src_mask, lp,
                               params["enc_ln_g"], params["enc_ln_b"],
                               add_pe=(li == 0), final_ln=(li == n - 1), nb=nb)
    return x


def decode(params, memory, src_mask, tgt, nb):
    x = jnp.take(params["tgt_emb"], tgt, axis=0)
    n = len(params["dec_layers"])
    for li, lp in enumerate(params["dec_layers"]):
        x = decoder_layer_call(x, memory, params["pe"], src_mask, lp,
                               params["dec_ln_g"], params["dec_ln_b"],
                               add_pe=(li == 0), final_ln=(li == n - 1), nb=nb)
    return x


def encoder_decoder_forward(params, src, tgt, src_mask, *, nb):
    # Decoder self-attention causal mask is generated inside the kernel.
    memory = encode(params, src, src_mask, nb)
    return decode(params, memory, src_mask, tgt, nb)


# ----------------------------- params ---------------------------------------------
def positional_encoding_table(max_len, d_model):
    pos = jnp.arange(max_len, dtype=jnp.float32)[:, None]
    div = jnp.exp(jnp.arange(0, d_model, 2, dtype=jnp.float32)
                  * -(math.log(10000.0) / d_model))
    pe = jnp.zeros((max_len, d_model), jnp.float32)
    pe = pe.at[:, 0::2].set(jnp.sin(pos * div))
    pe = pe.at[:, 1::2].set(jnp.cos(pos * div))
    return pe


def _init_linear(key, d_in, d_out):
    kw, kb = jax.random.split(key)
    w = 0.02 * jax.random.normal(kw, (d_in, d_out), jnp.float32)
    b = 0.02 * jax.random.normal(kb, (1, d_out), jnp.float32)
    return w, b


def _init_self_attn(key):
    kqkv, ko = jax.random.split(key)
    w_qkv, b_qkv = _init_linear(kqkv, D_MODEL, 3 * D_MODEL)     # fused Q|K|V
    scale = 1.0 / math.sqrt(D_HEAD)                             # fold attn scale into Q
    w_qkv = w_qkv.at[:, :D_MODEL].multiply(scale)
    b_qkv = b_qkv.at[:, :D_MODEL].multiply(scale)
    wo, bo = _init_linear(ko, D_MODEL, D_MODEL)
    return dict(w_qkv=w_qkv.astype(jnp.bfloat16), b_qkv=b_qkv,
                wo=wo.astype(jnp.bfloat16), bo=bo)


def _init_cross_attn(key):
    kq, kkv, ko = jax.random.split(key, 3)
    wq, bq = _init_linear(kq, D_MODEL, D_MODEL)
    scale = 1.0 / math.sqrt(D_HEAD)
    wq, bq = wq * scale, bq * scale
    w_kv, b_kv = _init_linear(kkv, D_MODEL, 2 * D_MODEL)        # fused K|V
    wo, bo = _init_linear(ko, D_MODEL, D_MODEL)
    return dict(wq=wq.astype(jnp.bfloat16), bq=bq,
                w_kv=w_kv.astype(jnp.bfloat16), b_kv=b_kv,
                wo=wo.astype(jnp.bfloat16), bo=bo)


def _init_ff(key):
    k1, k2 = jax.random.split(key)
    w1, b1 = _init_linear(k1, D_MODEL, D_FF)
    w2, b2 = _init_linear(k2, D_FF, D_MODEL)
    return dict(w1=w1.astype(jnp.bfloat16), b1=b1,
                w2=w2.astype(jnp.bfloat16), b2=b2)


def _ln_params():
    return jnp.ones((1, D_MODEL), jnp.float32), jnp.zeros((1, D_MODEL), jnp.float32)


def _init_encoder_layer(key):
    ka, kf = jax.random.split(key)
    g1, b1 = _ln_params()
    g2, b2 = _ln_params()
    return dict(self_attn=_init_self_attn(ka), ff=_init_ff(kf),
                ln1_g=g1, ln1_b=b1, ln2_g=g2, ln2_b=b2)


def _init_decoder_layer(key):
    ka, kc, kf = jax.random.split(key, 3)
    g1, b1 = _ln_params()
    g2, b2 = _ln_params()
    g3, b3 = _ln_params()
    return dict(self_attn=_init_self_attn(ka), src_attn=_init_cross_attn(kc),
                ff=_init_ff(kf),
                ln1_g=g1, ln1_b=b1, ln2_g=g2, ln2_b=b2, ln3_g=g3, ln3_b=b3)


def init_params(key):
    k_se, k_te, k_enc, k_dec = jax.random.split(key, 4)
    enc_keys = jax.random.split(k_enc, N_LAYERS)
    dec_keys = jax.random.split(k_dec, N_LAYERS)
    eg, eb = _ln_params()
    dg, db = _ln_params()
    return dict(
        src_emb=0.02 * jax.random.normal(k_se, (VOCAB_SRC, D_MODEL), jnp.float32),
        tgt_emb=0.02 * jax.random.normal(k_te, (VOCAB_TGT, D_MODEL), jnp.float32),
        pe=positional_encoding_table(MAX_LEN, D_MODEL),
        enc_layers=[_init_encoder_layer(k) for k in enc_keys],
        dec_layers=[_init_decoder_layer(k) for k in dec_keys],
        enc_ln_g=eg, enc_ln_b=eb,
        dec_ln_g=dg, dec_ln_b=db,
    )


# ----------------------------- plain-JAX reference (for the check) ----------------
def _ref_ln(x, g, b):
    d = x.shape[-1]
    m = jnp.mean(x, axis=-1, keepdims=True)
    c = x - m
    var = jnp.sum(c * c, axis=-1, keepdims=True) / (d - 1)
    return g * c / (jnp.sqrt(var) + EPS) + b


def _ref_mm(a, w):   # f32 activations, bf16 weights, f32 accumulation
    return jnp.einsum("bsk,kn->bsn", a.astype(jnp.bfloat16), w,
                      preferred_element_type=jnp.float32)


def _ref_mha(q, k, v, bias, wo):
    out = jnp.zeros(q.shape[:-1] + (D_MODEL,), jnp.float32)
    for h in range(N_HEADS):
        sl = slice(h * D_HEAD, (h + 1) * D_HEAD)
        s = jnp.einsum("bqd,bkd->bqk", q[..., sl].astype(jnp.bfloat16),
                       k[..., sl].astype(jnp.bfloat16),
                       preferred_element_type=jnp.float32) + bias
        p = jax.nn.softmax(s, axis=-1)
        ctx = jnp.einsum("bqk,bkd->bqd", p.astype(jnp.bfloat16),
                         v[..., sl].astype(jnp.bfloat16),
                         preferred_element_type=jnp.float32)
        out = out + jnp.einsum("bqd,de->bqe", ctx.astype(jnp.bfloat16), wo[sl, :],
                               preferred_element_type=jnp.float32)
    return out


def _ref_enc_layer(lp, x, bias):
    sa, ff = lp["self_attn"], lp["ff"]
    y = _ref_ln(x, lp["ln1_g"], lp["ln1_b"])
    qkv = _ref_mm(y, sa["w_qkv"]) + sa["b_qkv"]
    q, k, v = qkv[..., :D_MODEL], qkv[..., D_MODEL:2 * D_MODEL], qkv[..., 2 * D_MODEL:]
    x = x + _ref_mha(q, k, v, bias, sa["wo"]) + sa["bo"]
    y = _ref_ln(x, lp["ln2_g"], lp["ln2_b"])
    h = jnp.maximum(_ref_mm(y, ff["w1"]) + ff["b1"], 0.0)
    return x + _ref_mm(h, ff["w2"]) + ff["b2"]


def _ref_dec_layer(lp, x, mem, causal_bias, cross_bias):
    sa, ca, ff = lp["self_attn"], lp["src_attn"], lp["ff"]
    y = _ref_ln(x, lp["ln1_g"], lp["ln1_b"])
    qkv = _ref_mm(y, sa["w_qkv"]) + sa["b_qkv"]
    q, k, v = qkv[..., :D_MODEL], qkv[..., D_MODEL:2 * D_MODEL], qkv[..., 2 * D_MODEL:]
    x = x + _ref_mha(q, k, v, causal_bias, sa["wo"]) + sa["bo"]
    y = _ref_ln(x, lp["ln2_g"], lp["ln2_b"])
    q = _ref_mm(y, ca["wq"]) + ca["bq"]
    kv = _ref_mm(mem, ca["w_kv"]) + ca["b_kv"]
    k, v = kv[..., :D_MODEL], kv[..., D_MODEL:]
    x = x + _ref_mha(q, k, v, cross_bias, ca["wo"]) + ca["bo"]
    y = _ref_ln(x, lp["ln3_g"], lp["ln3_b"])
    h = jnp.maximum(_ref_mm(y, ff["w1"]) + ff["b1"], 0.0)
    return x + _ref_mm(h, ff["w2"]) + ff["b2"]


def reference_forward(params, src, tgt, src_mask):
    ss, st = src.shape[1], tgt.shape[1]
    enc_bias = (src_mask - 1.0) * (-NEG_INF)                   # (B,1,Ss)
    r = jnp.arange(st)
    causal = jnp.where(r[None, :] <= r[:, None], 0.0, NEG_INF)[None].astype(jnp.float32)
    x = jnp.take(params["src_emb"], src, axis=0) * EMB_SCALE + params["pe"][None, :ss, :]
    for lp in params["enc_layers"]:
        x = _ref_enc_layer(lp, x, enc_bias)
    mem = _ref_ln(x, params["enc_ln_g"], params["enc_ln_b"])
    y = jnp.take(params["tgt_emb"], tgt, axis=0) * EMB_SCALE + params["pe"][None, :st, :]
    for lp in params["dec_layers"]:
        y = _ref_dec_layer(lp, y, mem, causal, enc_bias)
    return _ref_ln(y, params["dec_ln_g"], params["dec_ln_b"])


# ----------------------------- main ----------------------------------------------
if __name__ == "__main__":
    key = jax.random.PRNGKey(0)
    k_param, k_src, k_tgt, k_x = jax.random.split(key, 4)

    B, S_SRC, S_TGT = 2, 8, 8
    params = init_params(k_param)

    # Generation-conditional batch grid: split across TensorCores only on
    # multi-TC chips (v7x); single grid step on single-TC v5e/v6e.
    try:
        kind = jax.devices()[0].device_kind.lower()
    except Exception:
        kind = ""
    nb = B if "v7" in kind else 1

    # --- standalone check of the spec module (PositionalEncoding) kernel -------
    x_pe = jax.random.normal(k_x, (B, S_SRC, D_MODEL), jnp.float32)
    pe_out = jax.block_until_ready(positional_encoding_forward(x_pe, params["pe"]))
    pe_ref = x_pe + params["pe"][None, :S_SRC, :]
    assert jnp.allclose(pe_out, pe_ref, atol=1e-6, rtol=1e-6)

    # --- fused encoder-decoder forward (4 pallas_calls) vs plain-JAX reference --
    src = jax.random.randint(k_src, (B, S_SRC), 0, VOCAB_SRC, dtype=jnp.int32)
    tgt = jax.random.randint(k_tgt, (B, S_TGT), 0, VOCAB_TGT, dtype=jnp.int32)
    src_mask = jnp.ones((B, 1, S_SRC), jnp.float32)   # 1 = keep; causal mask in-kernel

    forward = jax.jit(functools.partial(encoder_decoder_forward, nb=nb))
    out = jax.block_until_ready(forward(params, src, tgt, src_mask))
    ref = reference_forward(params, src, tgt, src_mask)

    assert out.shape == (B, S_TGT, D_MODEL)
    assert bool(jnp.all(jnp.isfinite(out)))
    # Loose bound absorbs approx-reciprocal (EUP) + bf16 MXU rounding differences;
    # outputs are LayerNorm-normalized (O(1)), so this still catches real bugs.
    assert float(jnp.max(jnp.abs(out - ref))) < 1e-1
    print("KERNEL_OK")
</pallas_src>

<mosaic_0001>
module attributes {stable_mosaic.version = 11 : i64} {
  func.func @_pe_add_kernel(%arg0: i32, %arg1: memref<2x8x128xf32, #tpu.memory_space<vmem>>, %arg2: memref<8x128xf32, #tpu.memory_space<vmem>>, %arg3: memref<2x8x128xf32, #tpu.memory_space<vmem>>) attributes {dimension_semantics = [#tpu.dimension_semantics<arbitrary>], iteration_bounds = array<i64: 1>, scalar_prefetch = 0 : i64, scratch_operands = 0 : i64, tpu.core_type = #tpu.core_type<tc>, window_params = [{pipeline_mode = #tpu.pipeline_mode<synchronous>, transform_indices = @transform_0, window_bounds = array<i64: 2, 8, 128>}, {transform_indices = @transform_1, window_bounds = array<i64: 8, 128>}, {pipeline_mode = #tpu.pipeline_mode<synchronous>, transform_indices = @transform_2, window_bounds = array<i64: 2, 8, 128>}]} {
    %c0 = arith.constant 0 : index
    %c0_0 = arith.constant 0 : index
    %c0_1 = arith.constant 0 : index
    %0 = vector.load %arg1[%c0, %c0_0, %c0_1] : memref<2x8x128xf32, #tpu.memory_space<vmem>>, vector<2x8x128xf32>
    %c0_2 = arith.constant 0 : index
    %c0_3 = arith.constant 0 : index
    %1 = vector.load %arg2[%c0_2, %c0_3] : memref<8x128xf32, #tpu.memory_space<vmem>>, vector<8x128xf32>
    %2 = vector.shape_cast %1 : vector<8x128xf32> to vector<1x8x128xf32>
    %3 = vector.broadcast %2 : vector<1x8x128xf32> to vector<2x8x128xf32>
    %4 = arith.addf %0, %3 : vector<2x8x128xf32>
    %c0_4 = arith.constant 0 : index
    %c0_5 = arith.constant 0 : index
    %c0_6 = arith.constant 0 : index
    %5 = vector.load %arg3[%c0_4, %c0_5, %c0_6] : memref<2x8x128xf32, #tpu.memory_space<vmem>>, vector<2x8x128xf32>
    tpu.vector_store %arg3[%c0_4, %c0_5, %c0_6], %4 {strides = array<i32>} : memref<2x8x128xf32, #tpu.memory_space<vmem>>, vector<2x8x128xf32>,
    return
  }
  func.func @transform_0(%arg0: i32) -> (i32, i32, i32) {
    %c0_i32 = arith.constant 0 : i32
    %c0_i32_0 = arith.constant 0 : i32
    %c0_i32_1 = arith.constant 0 : i32
    %c0_i32_2 = arith.constant 0 : i32
    return %c0_i32, %c0_i32_0, %c0_i32_1 : i32, i32, i32
  }
  func.func @transform_1(%arg0: i32) -> (i32, i32) {
    %c0_i32 = arith.constant 0 : i32
    %c0_i32_0 = arith.constant 0 : i32
    %c0_i32_1 = arith.constant 0 : i32
    return %c0_i32, %c0_i32_0 : i32, i32
  }
  func.func @transform_2(%arg0: i32) -> (i32, i32, i32) {
    %c0_i32 = arith.constant 0 : i32
    %c0_i32_0 = arith.constant 0 : i32
    %c0_i32_1 = arith.constant 0 : i32
    %c0_i32_2 = arith.constant 0 : i32
    return %c0_i32, %c0_i32_0, %c0_i32_1 : i32, i32, i32
  }
}

</mosaic_0001>

<bundles_post_ra>
// kernel: tpu_custom_call.1
= control target key start
LH: loop header
LB: loop body
LE: loop exit
PB: predicated region body
PF: predicated region fallthrough
CT: control target
= control target key end

     0   :  { %7 = vsyncpa [#allocation3], 0  ;;  %s169_s0 = inlined_call_operand.hbm [shape: f32[2,8,128], index: 0, kind: input, shape index: {}]   ;;  %s170_s1 = inlined_call_operand.hbm [shape: f32[5000,128], index: 1, kind: input, shape index: {}]   ;;  %s171_s2 = inlined_call_operand.hbm [shape: f32[2,8,128], index: 2, kind: output, shape index: {}]  }
   0x1   :  { %8 = vsyncpa [#allocation6], 0 }
   0x2   :  { %9 = vsyncpa [#allocation4], 0  ;;  %s134_s9 = smov [#allocation2]  }
   0x3   :  { %s15_s10 = sshll.u32 %s134_s9, 4  ;;  %s16_s10 = int_to_ptr.vmem [resolvable:$true] %s15_s10 }
   0x4   :  { %s76_s11 = scalar_lea.vmem %s16_s10, 256  ;;  %p81_p1 = scmp.lt.s32.totalorder %s16_s10, %s16_s10 }
   0x5   :  { %p77_p0 = scmp.ne.s32.totalorder %s16_s10, %s76_s11  ;;  %p82_p2 = scmp.lt.s32.totalorder %s76_s11, %s76_s11 }
   0x7   :  { %p83_p3 = por %p82_p2, %p81_p1 }
   0x9   :  { %p84_p4 = pnand %p83_p3, %p77_p0 }
   0xb   :  { %87 = shalt.err (!%p84_p4)
}
   0xc   :  { %s135_s12 = smov 128   ;;  %s136_s13 = smov 8  }
   0xd   :  { %21 = dma.hbm_to_vmem [thread:$0]  %s169_s0, 256, %s16_s10, [#allocation3], %s135_s12, %s135_s12, %s136_s13  }
   0xe   :  { %s137_s16 = smov [#allocation5]  }
   0xf   :  { %s28_s17 = sshll.u32 %s137_s16, 4  ;;  %s29_s17 = int_to_ptr.vmem [resolvable:$true] %s28_s17 }
  0x10   :  { %s96_s18 = scalar_lea.vmem %s29_s17, 128  ;;  %p101_p6 = scmp.lt.s32.totalorder %s29_s17, %s29_s17 }
  0x11   :  { %p97_p5 = scmp.ne.s32.totalorder %s29_s17, %s96_s18  ;;  %p102_p7 = scmp.lt.s32.totalorder %s96_s18, %s96_s18 }
  0x13   :  { %p103_p8 = por %p102_p7, %p101_p6 }
  0x15   :  { %p104_p9 = pnand %p103_p8, %p97_p5 }
  0x17   :  { %107 = shalt.err (!%p104_p9)
}
  0x18   :  { %31 = dma.hbm_to_vmem [thread:$0]  %s170_s1, 128, %s29_s17, [#allocation6]  }
  0x19   :  { %128 = dma.done.wait [#allocation3], 256  }
  0x1a   :  { %129 = vsyncadd [#allocation3], 4294967040 }
  0x1b   :  { %130 = dma.done.wait [#allocation6], 128  }
  0x1c   :  { %131 = vsyncadd [#allocation6], 4294967168  ;;  %s138_s21 = smov [#allocation7]   ;;  %v38_v0 = vld [vmem:[#allocation2] sm:$0xff]  ;;  %v40_v1 = vld [vmem:[#allocation5] sm:$0xff] }
  0x1d   :  { %s50_s0 = sshll.u32 %s138_s21, 4  ;;  %v39_v2 = vld [vmem:[#allocation2 + $0x8] sm:$0xff]  ;;  %v41_v3 = vadd.f32 %v40_v1, %v38_v0  ;;  %s51_s0 = int_to_ptr.vmem [resolvable:$true] %s50_s0 }
  0x1e   :  { %v42_v4 = vadd.f32 %v40_v1, %v39_v2  ;;  %s108_s22 = scalar_lea.vmem %s51_s0, 256  ;;  %p113_p11 = scmp.lt.s32.totalorder %s51_s0, %s51_s0 }
  0x1f   :  { %43 = vst [vmem:[#allocation7] sm:$0xff] %v41_v3  ;;  %p109_p10 = scmp.ne.s32.totalorder %s51_s0, %s108_s22  ;;  %p114_p12 = scmp.lt.s32.totalorder %s108_s22, %s108_s22 }
  0x20   :  { %44 = vst [vmem:[#allocation7 + $0x8] sm:$0xff] %v42_v4 }
  0x21   :  { %p115_p13 = por %p114_p12, %p113_p11 }
  0x23   :  { %p116_p0 = pnand %p115_p13, %p109_p10 }
  0x25   :  { %119 = shalt.err (!%p116_p0)
}
  0x26   :  { %56 = dma.vmem_to_hbm [thread:$0]  %s51_s0, 256, %s171_s2, [#allocation4], %s135_s12, %s135_s12, %s136_s13  }
  0x27   :  { %132 = dma.done.wait [#allocation4], 256  }
  0x28   :  { %133 = vsyncadd [#allocation4], 4294967040 }
  0x29   :  { %60 = vsyncpa [#allocation3], 1 }
  0x2a   :  { %61 = vsyncpa [#allocation6], 1 }
  0x2b   :  { %62 = vsyncpa [#allocation4], 1 }

</bundles_post_ra>
